<compile_context>
chip_gen: v7x
topology: tpu7x:2x2x1
jax: 0.10.0
libtpu: 0.0.40
codegen_flags: <defaults>
</compile_context>

<pallas_src>
import jax
import jax.numpy as jnp
from jax.experimental import pallas as pl
from jax.experimental.pallas import tpu as pltpu


def _make_autopool_kernel(*, time_on_lanes, block_t, t_total, compute_dtype,
                          accumulate_in_output):
    """Builds the kernel body for one of the two layouts.

    time_on_lanes=True : x block is (BB, C, TT)  (labels on sublanes, time on lanes)
    time_on_lanes=False: x block is (BB, TT, C)  (labels on lanes)
    """
    t_axis = 2 if time_on_lanes else 1
    c_axis = 1 if time_on_lanes else 2
    mask_tail = (t_total % block_t) != 0  # static

    def tile_partial(x_ref, alpha_ref):
        x = x_ref[...].astype(compute_dtype)

        valid = None
        if mask_tail:
            mshape = [1, 1, 1]
            mshape[t_axis] = x.shape[t_axis]
            iota = jax.lax.broadcasted_iota(jnp.int32, tuple(mshape), t_axis)
            valid = (pl.program_id(1) * block_t + iota) < t_total
            # Zero padded time columns so nothing non-finite reaches exp().
            x = jnp.where(valid, x, jnp.zeros_like(x))

        # alpha arrives pre-oriented from the wrapper: (C, 1) when time is on
        # lanes, (1, C) otherwise, so adding a leading dim needs no relayout.
        alpha = alpha_ref[...][None].astype(compute_dtype)

        sig = 0.5 * jnp.tanh(0.5 * x) + 0.5          # single EUP op per element
        a = sig * alpha                               # |a| <= |alpha|
        # No max-subtraction: a is bounded by |alpha|, exp cannot overflow.
        e = jnp.exp(a)
        denom = jnp.sum(e, axis=c_axis, keepdims=True)
        inv = pl.reciprocal(denom, approx=True)       # EUP vrcp (free slot)
        inv = inv * (2.0 - denom * inv)               # one Newton step (VPU)
        w = e * inv

        contrib = (sig * w).astype(jnp.float32)
        if mask_tail:
            contrib = jnp.where(valid, contrib, 0.0)
        return jnp.sum(contrib, axis=t_axis)          # (BB, C) f32

    if accumulate_in_output:
        # f32 output: accumulate directly in the resident output block.
        def kernel(x_ref, alpha_ref, o_ref):
            @pl.when(pl.program_id(1) == 0)
            def _():
                o_ref[...] = jnp.zeros_like(o_ref)
            o_ref[...] += tile_partial(x_ref, alpha_ref)
    else:
        # Non-f32 output: f32 scratch accumulator, cast on the last time tile.
        def kernel(x_ref, alpha_ref, o_ref, acc_ref):
            @pl.when(pl.program_id(1) == 0)
            def _():
                acc_ref[...] = jnp.zeros_like(acc_ref)
            acc_ref[...] += tile_partial(x_ref, alpha_ref)

            @pl.when(pl.program_id(1) == pl.num_programs(1) - 1)
            def _():
                o_ref[...] = acc_ref[...].astype(o_ref.dtype)

    return kernel


def autopool(x, alpha, *, block_b=None, block_t=None, compute_dtype=None,
             x_block_budget=8 * 1024 * 1024,
             vmem_limit_bytes=32 * 1024 * 1024):
    """x: (B, T, C), alpha: (C,) -> (B, C).  Matches the PyTorch Autopool fwd."""
    B, T, C = x.shape
    out_dtype = x.dtype
    if compute_dtype is None:
        compute_dtype = x.dtype
    compute_dtype = jnp.dtype(compute_dtype)

    # Layout choice: put the time axis on lanes whenever the label axis is
    # lane-narrow (C < 128).  The wrapper transpose costs one extra HBM pass
    # but makes every vreg of EUP/VPU work lane-dense (up to 4x for C=32).
    time_on_lanes = C < 128

    x_in = jnp.swapaxes(x, 1, 2) if time_on_lanes else x      # (B,C,T) or (B,T,C)
    if compute_dtype != x_in.dtype:
        # Narrower compute dtype (bf16 on v6e/v7x) also halves the HBM stream.
        x_in = x_in.astype(compute_dtype)
    itemsize = jnp.dtype(x_in.dtype).itemsize

    # --- time tile -----------------------------------------------------------
    if block_t is None:
        if T <= 128:
            block_t = T                                        # full extent
        else:
            # Largest multiple of 128 such that 8 batch rows fit the budget.
            cap = max(128, (x_block_budget // max(1, 8 * C * itemsize)) // 128 * 128)
            block_t = T if T <= cap else cap                   # tail -> masked

    # --- batch tile ----------------------------------------------------------
    if block_b is None:
        block_b = max(1, x_block_budget // max(1, block_t * C * itemsize))
        if B >= 16:
            # v7x megacore: keep at least two batch tiles so both TCs get work.
            block_b = min(block_b, ((B + 1) // 2 + 7) // 8 * 8)
        if block_b >= B:
            block_b = B
        elif block_b >= 8:
            block_b = (block_b // 8) * 8   # sublane-aligned partial output tiles

    grid = (pl.cdiv(B, block_b), pl.cdiv(T, block_t))

    if time_on_lanes:
        x_spec = pl.BlockSpec((block_b, C, block_t), lambda b, t: (b, 0, t))
        alpha2d = jnp.asarray(alpha, dtype=jnp.float32).reshape(C, 1)
        alpha_spec = pl.BlockSpec((C, 1), lambda b, t: (0, 0))
    else:
        x_spec = pl.BlockSpec((block_b, block_t, C), lambda b, t: (b, t, 0))
        alpha2d = jnp.asarray(alpha, dtype=jnp.float32).reshape(1, C)
        alpha_spec = pl.BlockSpec((1, C), lambda b, t: (0, 0))

    accumulate_in_output = jnp.dtype(out_dtype) == jnp.dtype(jnp.float32)
    kernel = _make_autopool_kernel(
        time_on_lanes=time_on_lanes, block_t=block_t, t_total=T,
        compute_dtype=compute_dtype, accumulate_in_output=accumulate_in_output)
    scratch = [] if accumulate_in_output else [pltpu.VMEM((block_b, C), jnp.float32)]

    return pl.pallas_call(
        kernel,
        out_shape=jax.ShapeDtypeStruct((B, C), out_dtype),
        grid_spec=pltpu.PrefetchScalarGridSpec(
            num_scalar_prefetch=0,
            grid=grid,
            in_specs=[x_spec, alpha_spec],
            # Same output block across the time axis -> stays resident while
            # the T reduction accumulates.
            out_specs=pl.BlockSpec((block_b, C), lambda b, t: (b, 0)),
            scratch_shapes=scratch,
        ),
        compiler_params=pltpu.CompilerParams(
            # Batch tiles are independent (shardable across v7x's 2 TCs);
            # the time axis is a reduction, so it must be "arbitrary".
            dimension_semantics=("parallel", "arbitrary"),
            vmem_limit_bytes=vmem_limit_bytes,
        ),
    )(x_in, alpha2d)


def autopool_ref(x, alpha):
    sig = jax.nn.sigmoid(x)
    a = sig * alpha
    w = jax.nn.softmax(a, axis=2)
    return jnp.sum(sig * w, axis=1)


def _check(x, alpha, **kwargs):
    out = jax.block_until_ready(autopool(x, alpha, **kwargs))
    ref = autopool_ref(x, alpha)
    assert out.shape == ref.shape
    assert jnp.allclose(out, ref, atol=1e-4, rtol=1e-4), \
        float(jnp.max(jnp.abs(out - ref)))


if __name__ == "__main__":
    key = jax.random.PRNGKey(0)

    # Primary, module-like small shape: batch=2, time=8, labels(input_size)=32.
    B, T, C = 2, 8, 32
    x = jax.random.normal(key, (B, T, C), dtype=jnp.float32)
    alpha = jnp.ones((C,), dtype=jnp.float32)   # matches nn.Module init: ones(C)
    _check(x, alpha)

    # Multi-tile grid: exercises the time-axis accumulation + parallel batch tiles.
    k1, k2, k3 = jax.random.split(key, 3)
    x2 = jax.random.normal(k1, (16, 256, 32), dtype=jnp.float32)
    _check(x2, jnp.ones((32,), jnp.float32), block_b=8, block_t=128)

    # Tail time tile (T not a multiple of block_t): exercises in-kernel masking.
    x3 = jax.random.normal(k2, (2, 192, 32), dtype=jnp.float32)
    _check(x3, jnp.ones((32,), jnp.float32), block_t=128)

    # Lane-wide label axis (C >= 128): exercises the (B, T, C) layout path.
    x4 = jax.random.normal(k3, (2, 16, 256), dtype=jnp.float32)
    _check(x4, jnp.ones((256,), jnp.float32))

    print("KERNEL_OK")
</pallas_src>

<mosaic_0001>
module attributes {stable_mosaic.version = 11 : i64} {
  func.func @kernel(%arg0: i32, %arg1: i32, %arg2: memref<2x32x8xf32, #tpu.memory_space<vmem>>, %arg3: memref<32x1xf32, #tpu.memory_space<vmem>>, %arg4: memref<2x32xf32, #tpu.memory_space<vmem>>) attributes {dimension_semantics = [#tpu.dimension_semantics<parallel>, #tpu.dimension_semantics<arbitrary>], iteration_bounds = array<i64: 1, 1>, scalar_prefetch = 0 : i64, scratch_operands = 0 : i64, tpu.core_type = #tpu.core_type<tc>, window_params = [{transform_indices = @transform_0, window_bounds = array<i64: 2, 32, 8>}, {pipeline_mode = #tpu.pipeline_mode<synchronous>, transform_indices = @transform_1, window_bounds = array<i64: 32, 1>}, {transform_indices = @transform_2, window_bounds = array<i64: 2, 32>}]} {
    %c0_i32 = arith.constant 0 : i32
    %0 = arith.cmpi eq, %arg1, %c0_i32 : i32
    %1 = arith.extui %0 : i1 to i32
    %c0_i32_0 = arith.constant 0 : i32
    %2 = arith.cmpi ne, %1, %c0_i32_0 : i32
    scf.if %2 {
      %cst_14 = arith.constant 0.000000e+00 : f32
      %30 = vector.broadcast %cst_14 : f32 to vector<2x32xf32>
      %c0_15 = arith.constant 0 : index
      %c0_16 = arith.constant 0 : index
      %31 = vector.load %arg4[%c0_15, %c0_16] : memref<2x32xf32, #tpu.memory_space<vmem>>, vector<2x32xf32>
      tpu.vector_store %arg4[%c0_15, %c0_16], %30 {strides = array<i32>} : memref<2x32xf32, #tpu.memory_space<vmem>>, vector<2x32xf32>,
    } else {
    }
    %c0 = arith.constant 0 : index
    %c0_1 = arith.constant 0 : index
    %3 = vector.load %arg4[%c0, %c0_1] : memref<2x32xf32, #tpu.memory_space<vmem>>, vector<2x32xf32>
    %c0_2 = arith.constant 0 : index
    %c0_3 = arith.constant 0 : index
    %c0_4 = arith.constant 0 : index
    %4 = vector.load %arg2[%c0_2, %c0_3, %c0_4] : memref<2x32x8xf32, #tpu.memory_space<vmem>>, vector<2x32x8xf32>
    %c0_5 = arith.constant 0 : index
    %c0_6 = arith.constant 0 : index
    %5 = vector.load %arg3[%c0_5, %c0_6] : memref<32x1xf32, #tpu.memory_space<vmem>>, vector<32x1xf32>
    %6 = vector.shape_cast %5 : vector<32x1xf32> to vector<1x32x1xf32>
    %cst = arith.constant 5.000000e-01 : f32
    %7 = vector.broadcast %cst : f32 to vector<2x32x8xf32>
    %8 = arith.mulf %7, %4 : vector<2x32x8xf32>
    %9 = math.tanh %8 : vector<2x32x8xf32>
    %cst_7 = arith.constant 5.000000e-01 : f32
    %10 = vector.broadcast %cst_7 : f32 to vector<2x32x8xf32>
    %11 = arith.mulf %10, %9 : vector<2x32x8xf32>
    %cst_8 = arith.constant 5.000000e-01 : f32
    %12 = vector.broadcast %cst_8 : f32 to vector<2x32x8xf32>
    %13 = arith.addf %11, %12 : vector<2x32x8xf32>
    %14 = vector.broadcast %6 : vector<1x32x1xf32> to vector<2x32x8xf32>
    %15 = arith.mulf %13, %14 : vector<2x32x8xf32>
    %16 = math.exp %15 : vector<2x32x8xf32>
    %cst_9 = arith.constant dense<0.000000e+00> : vector<2x8xf32>
    %17 = vector.multi_reduction <add>, %16, %cst_9 [1] : vector<2x32x8xf32> to vector<2x8xf32>
    %18 = vector.shape_cast %17 : vector<2x8xf32> to vector<2x1x8xf32>
    %19 = tpu.reciprocal %18 {approx = true} : vector<2x1x8xf32> -> vector<2x1x8xf32>
    %20 = arith.mulf %18, %19 : vector<2x1x8xf32>
    %cst_10 = arith.constant 2.000000e+00 : f32
    %21 = vector.broadcast %cst_10 : f32 to vector<2x1x8xf32>
    %22 = arith.subf %21, %20 : vector<2x1x8xf32>
    %23 = arith.mulf %19, %22 : vector<2x1x8xf32>
    %24 = vector.broadcast %23 : vector<2x1x8xf32> to vector<2x32x8xf32>
    %25 = arith.mulf %16, %24 : vector<2x32x8xf32>
    %26 = arith.mulf %13, %25 : vector<2x32x8xf32>
    %cst_11 = arith.constant dense<0.000000e+00> : vector<2x32xf32>
    %27 = vector.multi_reduction <add>, %26, %cst_11 [2] : vector<2x32x8xf32> to vector<2x32xf32>
    %28 = arith.addf %3, %27 : vector<2x32xf32>
    %c0_12 = arith.constant 0 : index
    %c0_13 = arith.constant 0 : index
    %29 = vector.load %arg4[%c0_12, %c0_13] : memref<2x32xf32, #tpu.memory_space<vmem>>, vector<2x32xf32>
    tpu.vector_store %arg4[%c0_12, %c0_13], %28 {strides = array<i32>} : memref<2x32xf32, #tpu.memory_space<vmem>>, vector<2x32xf32>,
    return
  }
  func.func @transform_0(%arg0: i32, %arg1: i32) -> (i32, i32, i32) {
    %c0_i32 = arith.constant 0 : i32
    %c0_i32_0 = arith.constant 0 : i32
    return %arg0, %c0_i32, %arg1 : i32, i32, i32
  }
  func.func @transform_1(%arg0: i32, %arg1: i32) -> (i32, i32) {
    %c0_i32 = arith.constant 0 : i32
    %c0_i32_0 = arith.constant 0 : i32
    %c0_i32_1 = arith.constant 0 : i32
    return %c0_i32, %c0_i32_0 : i32, i32
  }
  func.func @transform_2(%arg0: i32, %arg1: i32) -> (i32, i32) {
    %c0_i32 = arith.constant 0 : i32
    %c0_i32_0 = arith.constant 0 : i32
    return %arg0, %c0_i32 : i32, i32
  }
}

</mosaic_0001>

<bundles_post_ra>
// kernel: tpu_custom_call.1
= control target key start
LH: loop header
LB: loop body
LE: loop exit
PB: predicated region body
PF: predicated region fallthrough
CT: control target
= control target key end

     0   :  { %v321_v2 = vmov 0   ;;  %s437_s0 = inlined_call_operand.vmem [shape: f32[2,32,8], index: 0, kind: input, shape index: {}]   ;;  %s438_s1 = inlined_call_operand.vmem [shape: f32[32,1], index: 1, kind: input, shape index: {}]   ;;  %s439_s2 = inlined_call_operand.hbm [shape: f32[2,32], index: 2, kind: output, shape index: {}]  }
   0x1   :  { %v29_v0 = vld [vmem:[%s438_s1 + $0x10] sm:$0xff]  ;;  %v27_v1 = vld [vmem:[%s438_s1] sm:$0xff]  ;;  %260 = vset.pattern.permute.xlu1 %v321_v2  ;;  %259 = vset.pattern.permute.xlu0 %v321_v2  ;;  %v30_v3 = vld [vmem:[%s438_s1 + $0x18] sm:$0xff] }
   0x2   :  { %75 = vperm.xlu1 %260, %v29_v0   ;;  %65 = vperm.xlu0 %259, %v27_v1   ;;  %v28_v4 = vld [vmem:[%s438_s1 + $0x8] sm:$0xff] }
   0x3   :  { %7 = vsyncpa [#allocation3], 0  ;;  %v21_v5 = vld [vmem:[%s437_s0 + $0x10] sm:$0xff]  ;;  %v19_v7 = vld [vmem:[%s437_s0] sm:$0xff]  ;;  %vm107_vm0 = vcmask 64512   ;;  %vm16_vm1 = vcmask 254976  }
   0x4   :  { %v25_v6 = vld [vmem:[%s437_s0 + $0x30] sm:$0xff]  ;;  %v33_v8 = vmul.f32 0.5, %v21_v5  ;;  %v23_v9 = vld [vmem:[%s437_s0 + $0x20] sm:$0xff]  ;;  %v22_v11 = vld [vmem:[%s437_s0 + $0x18] sm:$0xff]  ;;  %v31_v12 = vmul.f32 0.5, %v19_v7  ;;  %vm201_vm2 = vcmask 130112  }
   0x5   :  { %v37_v10 = vmul.f32 0.5, %v25_v6  ;;  %v26_v13 = vld [vmem:[%s437_s0 + $0x38] sm:$0xff]  ;;  %v35_v14 = vmul.f32 0.5, %v23_v9  ;;  %v20_v15 = vld [vmem:[%s437_s0 + $0x8] sm:$0xff]  ;;  %v34_v16 = vmul.f32 0.5, %v22_v11  ;;  %vm208_vm3 = vcmask 195712  }
   0x6   :  { %80 = vperm.xlu1 %260, %v30_v3   ;;  %70 = vperm.xlu0 %259, %v28_v4   ;;  %261 = vtanh.f32 %v33_v8  ;;  %v24_v17 = vld [vmem:[%s437_s0 + $0x28] sm:$0xff]  ;;  %v38_v18 = vmul.f32 0.5, %v26_v13  ;;  %v32_v19 = vmul.f32 0.5, %v20_v15  ;;  %vm215_vm4 = vcmask 261312   ;;  %s323_s0 = smov [#allocation2]  }
   0x7   :  { %263 = vtanh.f32 %v37_v10  ;;  %v36_v20 = vmul.f32 0.5, %v24_v17  ;;  %vm236_vm5 = vcmask 1041409   ;;  %s248_s4 = sshll.u32 %s323_s0, 4  ;;  %s249_s4 = int_to_ptr.vmem [resolvable:$true] %s248_s4 }
   0x8   :  { %265 = vtanh.f32 %v31_v12  ;;  %s297_s5 = scalar_lea.vmem %s249_s4, 32  ;;  %p302_p1 = scmp.lt.s32.totalorder %s249_s4, %s249_s4 }
   0x9   :  { %267 = vtanh.f32 %v35_v14  ;;  %p298_p0 = scmp.ne.s32.totalorder %s249_s4, %s297_s5  ;;  %p303_p2 = scmp.lt.s32.totalorder %s297_s5, %s297_s5 }
   0xa   :  { %269 = vtanh.f32 %v34_v16 }
   0xb   :  { %271 = vtanh.f32 %v38_v18  ;;  %p304_p3 = por %p303_p2, %p302_p1 }
   0xc   :  { %273 = vtanh.f32 %v32_v19 }
   0xd   :  { %275 = vtanh.f32 %v36_v20  ;;  %p305_p4 = pnand %p304_p3, %p298_p0 }
  0x10   :  { %v262_v21 = vpop.eup %261 }
  0x11   :  { %v264_v22 = vpop.eup %263  ;;  %v49_v27 = vmul.f32 0.5, %v262_v21 }
  0x12   :  { %v266_v23 = vpop.eup %265  ;;  %v53_v28 = vmul.f32 0.5, %v264_v22 }
  0x13   :  { %v268_v24 = vpop.eup %267  ;;  %v47_v29 = vmul.f32 0.5, %v266_v23  ;;  %v375_v34 = vadd.f32 0.5, %v49_v27 }
  0x14   :  { %v270_v25 = vpop.eup %269  ;;  %v51_v31 = vmul.f32 0.5, %v268_v24  ;;  %v377_v35 = vadd.f32 0.5, %v53_v28 }
  0x15   :  { %v272_v26 = vpop.eup %271  ;;  %v50_v33 = vmul.f32 0.5, %v270_v25  ;;  %v379_v36 = vadd.f32 0.5, %v47_v29 }
  0x16   :  { %v274_v30 = vpop.eup %273  ;;  %v381_v38 = vadd.f32 0.5, %v51_v31  ;;  %v54_v39 = vmul.f32 0.5, %v272_v26 }
  0x17   :  { %v276_v32 = vpop.eup %275  ;;  %v48_v37 = vmul.f32 0.5, %v274_v30  ;;  %v383_v43 = vadd.f32 0.5, %v50_v33 }
  0x18   :  { %v52_v40 = vmul.f32 0.5, %v276_v32  ;;  %v391_v49 = vadd.f32 0.5, %v54_v39 }
  0x19   :  { %v388_v47 = vadd.f32 0.5, %v48_v37 }
  0x1a   :  { %v393_v50 = vadd.f32 0.5, %v52_v40 }
  0x81   :  { %v76_v41 = vpop.permute.xlu1 %75  ;;  %v66_v42 = vpop.permute.xlu0 %65 }
  0x82   :  { %v85_v44 = vmul.f32 %v76_v41, %v375_v34  ;;  %v89_v45 = vmul.f32 %v76_v41, %v377_v35  ;;  %v83_v46 = vmul.f32 %v66_v42, %v379_v36  ;;  %v87_v48 = vmul.f32 %v66_v42, %v381_v38 }
  0x84   :  { %v95_v51 = vmul.f32 1.442695, %v85_v44  ;;  %v103_v52 = vmul.f32 1.442695, %v89_v45  ;;  %v91_v55 = vmul.f32 1.442695, %v83_v46 }
  0x85   :  { %v81_v53 = vpop.permute.xlu1 %80  ;;  %v71_v54 = vpop.permute.xlu0 %70  ;;  %v99_v58 = vmul.f32 1.442695, %v87_v48 }
  0x86   :  { %v86_v56 = vmul.f32 %v81_v53, %v383_v43  ;;  %v84_v57 = vmul.f32 %v71_v54, %v388_v47  ;;  %v90_v59 = vmul.f32 %v81_v53, %v391_v49  ;;  %v88_v60 = vmul.f32 %v71_v54, %v393_v50 }
  0x87   :  { %277 = vpow2.f32 %v95_v51 }
  0x88   :  { %v93_v61 = vmul.f32 1.442695, %v84_v57  ;;  %279 = vpow2.f32 %v103_v52  ;;  %v101_v62 = vmul.f32 1.442695, %v88_v60  ;;  %v97_v63 = vmul.f32 1.442695, %v86_v56 }
  0x89   :  { %281 = vpow2.f32 %v91_v55  ;;  %v105_v0 = vmul.f32 1.442695, %v90_v59 }
  0x8a   :  { %283 = vpow2.f32 %v99_v58 }
  0x8b   :  { %285 = vpow2.f32 %v93_v61 }
  0x8c   :  { %287 = vpow2.f32 %v101_v62 }
  0x8d   :  { %289 = vpow2.f32 %v97_v63 }
  0x8e   :  { %291 = vpow2.f32 %v105_v0 }
  0x91   :  { %v278_v1 = vpop.eup %277 }
  0x92   :  { %v280_v2 = vpop.eup %279  ;;  %v111_v14 = vsel %vm107_vm0, %v278_v1, 0.0 }
  0x93   :  { %v282_v3 = vpop.eup %281  ;;  %v124_v16 = vsel %vm107_vm0, %v280_v2, 0.0 }
  0x94   :  { %v284_v4 = vpop.eup %283  ;;  %v108_v7 = vsel %vm107_vm0, %v282_v3, 0.0 }
  0x95   :  { %v286_v5 = vpop.eup %285  ;;  %v121_v10 = vsel %vm107_vm0, %v284_v4, 0.0 }
  0x96   :  { %v288_v6 = vpop.eup %287  ;;  %v109_v8 = vsel %vm107_vm0, %v286_v5, 0.0 }
  0x97   :  { %v290_v9 = vpop.eup %289  ;;  %v110_v11 = vadd.f32 %v109_v8, %v108_v7  ;;  %v122_v12 = vsel %vm107_vm0, %v288_v6, 0.0 }
  0x98   :  { %v292_v13 = vpop.eup %291  ;;  %v123_v15 = vadd.f32 %v122_v12, %v121_v10  ;;  %v113_v18 = vsel %vm107_vm0, %v290_v9, 0.0 }
  0x99   :  { %v112_v17 = vadd.f32 %v111_v14, %v110_v11  ;;  %v126_v20 = vsel %vm107_vm0, %v292_v13, 0.0 }
  0x9a   :  { %v125_v19 = vadd.f32 %v124_v16, %v123_v15 }
  0x9b   :  { %v114_v21 = vadd.f32 %v113_v18, %v112_v17 }
  0x9c   :  { %v127_v22 = vadd.f32 %v126_v20, %v125_v19 }
  0x9d   :  { %v115_v23 = vrot.slane %v114_v21, 4 }
  0x9e   :  { %v128_v24 = vrot.slane %v127_v22, 4 }
  0x9f   :  { %v116_v25 = vadd.f32 %v115_v23, %v114_v21 }
  0xa0   :  { %v129_v26 = vadd.f32 %v128_v24, %v127_v22 }
  0xa1   :  { %v117_v27 = vrot.slane %v116_v25, 2 }
  0xa2   :  { %v130_v28 = vrot.slane %v129_v26, 2 }
  0xa3   :  { %v118_v29 = vadd.f32 %v117_v27, %v116_v25 }
  0xa4   :  { %v131_v30 = vadd.f32 %v130_v28, %v129_v26 }
  0xa5   :  { %v119_v31 = vrot.slane %v118_v29, 1 }
  0xa6   :  { %v132_v32 = vrot.slane %v131_v30, 1 }
  0xa7   :  { %v120_v33 = vadd.f32 %v119_v31, %v118_v29 }
  0xa8   :  { %v133_v37 = vadd.f32 %v132_v32, %v131_v30 }
  0xa9   :  { %293 = vrcp.f32 %v120_v33 }
  0xaa   :  { %295 = vrcp.f32 %v133_v37 }
  0xb3   :  { %v294_v39 = vpop.eup %293 }
  0xb4   :  { %v296_v40 = vpop.eup %295  ;;  %v136_v41 = vmul.f32 %v294_v39, %v120_v33 }
  0xb5   :  { %v137_v42 = vmul.f32 %v296_v40, %v133_v37 }
  0xb6   :  { %v138_v44 = vsub.f32 2.0, %v136_v41 }
  0xb7   :  { %v139_v45 = vsub.f32 2.0, %v137_v42 }
  0xb8   :  { %v140_v46 = vmul.f32 %v294_v39, %v138_v44 }
  0xb9   :  { %v141_v48 = vmul.f32 %v296_v40, %v139_v45 }
  0xba   :  { %v143_v51 = vmul.f32 %v286_v5, %v140_v46  ;;  %v142_v52 = vmul.f32 %v282_v3, %v140_v46  ;;  %v144_v53 = vmul.f32 %v278_v1, %v140_v46  ;;  %v145_v57 = vmul.f32 %v290_v9, %v140_v46 }
  0xbb   :  { %v146_v54 = vmul.f32 %v284_v4, %v141_v48  ;;  %v147_v58 = vmul.f32 %v288_v6, %v141_v48  ;;  %v148_v63 = vmul.f32 %v280_v2, %v141_v48  ;;  %v190_v6 = vlaneseq }
  0xbc   :  { %v151_v55 = vmul.f32 %v143_v51, %v388_v47  ;;  %v150_v56 = vmul.f32 %v142_v52, %v379_v36  ;;  %v152_v61 = vmul.f32 %v144_v53, %v375_v34  ;;  %v153_v47 = vmul.f32 %v145_v57, %v383_v43 }
  0xbd   :  { %v154_v62 = vmul.f32 %v146_v54, %v381_v38  ;;  %v155_v36 = vmul.f32 %v147_v58, %v393_v50  ;;  %v156_v34 = vmul.f32 %v148_v63, %v377_v35  ;;  %v149_v38 = vmul.f32 %v292_v13, %v141_v48 }
  0xbe   :  { %v161_v59 = vsel %vm107_vm0, %v151_v55, 0.0  ;;  %v158_v60 = vsel %vm107_vm0, %v150_v56, 0.0  ;;  %v164_v0 = vsel %vm107_vm0, %v152_v61, 0.0  ;;  %v167_v3 = vsel %vm107_vm0, %v153_v47, 0.0 }
  0xbf   :  { %162 = vadd.xlane.f32.xlu1 %v161_v59  ;;  %159 = vadd.xlane.f32.xlu0 %v158_v60  ;;  %v170_v1 = vsel %vm107_vm0, %v154_v62, 0.0  ;;  %v173_v4 = vsel %vm107_vm0, %v155_v36, 0.0  ;;  %v176_v2 = vsel %vm107_vm0, %v156_v34, 0.0  ;;  %v157_v5 = vmul.f32 %v149_v38, %v391_v49 }
  0xc0   :  { %v322_v50 = vmov 0.0   ;;  %v191_v9 = vand.u32 127, %v190_v6  ;;  %v193_v10 = vshrl.u32 %v190_v6, 7 }
  0xc1   :  { %v179_v43 = vsel %vm107_vm0, %v157_v5, 0.0  ;;  %17 = vst.msk [vmem:[#allocation2] sm:$0x3] %vm16_vm1, %v322_v50 }
  0xc2   :  { %v196_v11 = vadd.s32 4294967288, %v191_v9  ;;  %v203_v12 = vadd.s32 4294967280, %v191_v9  ;;  %v210_v14 = vadd.s32 4294967272, %v191_v9  ;;  %v194_v16 = vsub.s32 %v191_v9, %v193_v10 }
  0xc3   :  { %165 = vadd.xlane.f32.xlu1 %v164_v0  ;;  %171 = vadd.xlane.f32.xlu0 %v170_v1 }
  0xc4   :  { %v199_v49 = vsub.s32 %v196_v11, %v193_v10  ;;  %v206_v17 = vsub.s32 %v203_v12, %v193_v10  ;;  %v213_v18 = vsub.s32 %v210_v14, %v193_v10 }
  0xc7   :  { %168 = vadd.xlane.f32.xlu1 %v167_v3  ;;  %174 = vadd.xlane.f32.xlu0 %v173_v4 }
  0xc8   :  { %v18_v37 = vld [vmem:[#allocation2] sm:$0x3] }
  0xcb   :  { %177 = vadd.xlane.f32.xlu0 %v176_v2 }
  0xcf   :  { %180 = vadd.xlane.f32.xlu0 %v179_v43 }
 0x14c   :  { %v163_v7 = vpop.xlane.xlu1 %162  ;;  %v160_v8 = vpop.xlane.xlu0 %159 }
 0x14d   :  { %v200_v21 = vrot.slane %v163_v7, %v199_v49  ;;  %v195_v22 = vrot.slane %v160_v8, %v194_v16 }
 0x14f   :  { %v202_v29 = vsel %vm201_vm2, %v200_v21, %v195_v22 }
 0x150   :  { %v172_v35 = vpop.xlane.xlu0 %171  ;;  %v166_v13 = vpop.xlane.xlu1 %165 }
 0x151   :  { %v207_v24 = vrot.slane %v166_v13, %v206_v17  ;;  %v220_v26 = vrot.slane %v172_v35, %v194_v16 }
 0x153   :  { %v209_v32 = vsel %vm208_vm3, %v207_v24, %v202_v29 }
 0x154   :  { %v175_v15 = vpop.xlane.xlu0 %174  ;;  %v169_v19 = vpop.xlane.xlu1 %168 }
 0x155   :  { %v224_v23 = vrot.slane %v175_v15, %v199_v49  ;;  %v214_v27 = vrot.slane %v169_v19, %v213_v18 }
 0x157   :  { %v225_v30 = vsel %vm201_vm2, %v224_v23, %v220_v26  ;;  %v216_v39 = vsel %vm215_vm4, %v214_v27, %v209_v32 }
 0x158   :  { %v178_v20 = vpop.xlane.xlu0 %177 }
 0x159   :  { %v229_v25 = vrot.slane %v178_v20, %v206_v17 }
 0x15b   :  { %v230_v33 = vsel %vm208_vm3, %v229_v25, %v225_v30 }
 0x15c   :  { %v181_v28 = vpop.xlane.xlu0 %180 }
 0x15d   :  { %v234_v31 = vrot.slane %v181_v28, %v213_v18 }
 0x15f   :  { %v235_v40 = vsel %vm215_vm4, %v234_v31, %v230_v33 }
 0x160   :  { %v237_v41 = vsel %vm236_vm5, %v235_v40, %v216_v39 }
 0x161   :  { %v239_v42 = vadd.f32 %v237_v41, %v18_v37 }
 0x163   :  { %241 = vst.msk [vmem:[#allocation2] sm:$0x3] %vm16_vm1, %v239_v42 }
 0x164   :  { %308 = shalt.err (!%p305_p4)
}
 0x165   :  { %s309_s8 = scalar_lea.hbm %s439_s2, 32 }
 0x166   :  { %p310_p5 = scmp.ne.s32.totalorder %s439_s2, %s309_s8  ;;  %p313_p6 = scmp.lt.u32.totalorder %s309_s8, %s439_s2 }
 0x168   :  { %p315_p7 = pnand %p313_p6, %p310_p5 }
 0x16a   :  { %318 = shalt.err (!%p315_p7)
}
 0x16b   :  { %251 = dma.vmem_to_hbm [thread:$0]  %s249_s4, 32, %s439_s2, [#allocation3]  }
 0x16c   :  { %319 = dma.done.wait [#allocation3], 32  }
 0x16d   :  { %320 = vsyncadd [#allocation3], 4294967264 }
 0x16e   :  { %255 = vsyncpa [#allocation3], 1 }

</bundles_post_ra>
